<compile_context>
chip_gen: v7x
topology: tpu7x:2x2x1
jax: 0.10.0
libtpu: 0.0.40
codegen_flags: <defaults>
</compile_context>

<pallas_src>
import functools

import jax
import jax.numpy as jnp
from jax import lax
from jax.experimental import pallas as pl
from jax.experimental.pallas import tpu as pltpu

INPUT_SIZE = 100
IN_PAD = 128          # feature dim zero-padded to the 128-lane tile
H1 = 512
H2 = 256
OUT = 1
DEFAULT_TB = 4096     # batch tile; ~20 MiB of VMEM intermediates, fits all gens


def _disc_kernel(x_ref, w1_ref, b1_ref, w2_ref, b2_ref, w3_ref, b3_ref, o_ref):
    # Layer 1: (TB,128)bf16 @ (128,512)bf16 -> f32 acc; bf16 epilogue (bias+ReLU).
    h1 = jnp.dot(x_ref[...], w1_ref[...], preferred_element_type=jnp.float32)
    h1 = jnp.maximum(h1.astype(jnp.bfloat16) + b1_ref[...], 0.0)     # bf16 VPU

    # Layer 2: (TB,512)bf16 @ (512,256)bf16 -> f32 acc; bf16 epilogue.
    h2 = jnp.dot(h1, w2_ref[...], preferred_element_type=jnp.float32)
    h2 = jnp.maximum(h2.astype(jnp.bfloat16) + b2_ref[...], 0.0)     # bf16 VPU

    # Layer 3 (out_features == 1): contract the 256 dim of h2 against the w3 row,
    # producing a lane-dense (1, TB) logits row directly (q @ k.T - style MXU
    # pass with M=1) -- avoids a (TB,1) masked, 1-lane-wide store.
    logits = lax.dot_general(
        w3_ref[...], h2,
        dimension_numbers=(((1,), (1,)), ((), ())),
        preferred_element_type=jnp.float32,
    ) + b3_ref[...]                                                   # (1, TB) f32

    # Sigmoid; the divide rides the EUP reciprocal slot.
    o_ref[...] = pl.reciprocal(1.0 + jnp.exp(-logits),
                               approx=True).astype(o_ref.dtype)


def prepare_params(w1, b1, w2, b2, w3, b3):
    """One-time layout prep: zero-pad w1's K to 128, cast matmul operands to bf16.

    PyTorch-equivalent weights stored transposed: w1 (100,512), w2 (512,256),
    w3 (256,1); biases (512,), (256,), (1,).
    """
    w1p = jnp.pad(w1, ((0, IN_PAD - INPUT_SIZE), (0, 0))).astype(jnp.bfloat16)
    b1p = b1.reshape(1, H1).astype(jnp.bfloat16)
    w2p = w2.astype(jnp.bfloat16)
    b2p = b2.reshape(1, H2).astype(jnp.bfloat16)
    w3p = w3.reshape(1, H2).astype(jnp.bfloat16)     # (256,1) -> row (1,256)
    b3p = b3.reshape(1, 1).astype(jnp.float32)
    return w1p, b1p, w2p, b2p, w3p, b3p


def discriminator_forward(x, w1p, b1p, w2p, b2p, w3p, b3p, *, tb=DEFAULT_TB):
    """x: (B, 100) f32; prepared params from prepare_params(). Returns (B, 1) f32."""
    B = x.shape[0]

    # --- batch tile selection (all static under jit) --------------------------
    b16 = ((B + 15) // 16) * 16                      # bf16 sublane packing
    tb_r = ((max(int(tb), 16) + 127) // 128) * 128   # lane-aligned tile for grids > 1
    TB = min(tb_r, b16)                              # small B -> whole batch, one step
    B_pad = ((B + TB - 1) // TB) * TB
    n_tiles = B_pad // TB

    # --- per-call input prep: pad features 100->128, pad batch, cast bf16 -----
    x_p = jnp.pad(x, ((0, 0), (0, IN_PAD - INPUT_SIZE)))
    if B_pad != B:
        x_p = jnp.pad(x_p, ((0, B_pad - B), (0, 0)))
    x_bf = x_p.astype(jnp.bfloat16)

    flops = 2 * B_pad * (IN_PAD * H1 + H1 * H2 + H2 * OUT)
    bytes_accessed = (
        x_bf.size * 2
        + (w1p.size + b1p.size + w2p.size + b2p.size + w3p.size) * 2
        + b3p.size * 4
        + B_pad * 4)

    out = pl.pallas_call(
        _disc_kernel,
        out_shape=jax.ShapeDtypeStruct((1, B_pad), jnp.float32),
        grid=(n_tiles,),
        in_specs=[
            pl.BlockSpec((TB, IN_PAD), lambda i: (i, 0)),    # x: tiled over batch
            pl.BlockSpec((IN_PAD, H1), lambda i: (0, 0)),    # w1: VMEM-resident
            pl.BlockSpec((1, H1), lambda i: (0, 0)),         # b1 (bf16)
            pl.BlockSpec((H1, H2), lambda i: (0, 0)),        # w2
            pl.BlockSpec((1, H2), lambda i: (0, 0)),         # b2 (bf16)
            pl.BlockSpec((1, H2), lambda i: (0, 0)),         # w3 row (bf16)
            pl.BlockSpec((1, 1), lambda i: (0, 0)),          # b3 (f32)
        ],
        out_specs=pl.BlockSpec((1, TB), lambda i: (0, i)),   # lane-dense row output
        compiler_params=pltpu.CompilerParams(
            dimension_semantics=("parallel",),
            vmem_limit_bytes=48 * 1024 * 1024,               # safe on v7x's 64 MiB
        ),
        cost_estimate=pl.CostEstimate(
            flops=flops, transcendentals=2 * B_pad, bytes_accessed=bytes_accessed),
    )(x_bf, w1p, b1p, w2p, b2p, w3p, b3p)

    return out.reshape(B_pad, 1)[:B]


def init_params(key):
    """Deterministic init matching PyTorch Linear shapes (stored transposed)."""
    ks = jax.random.split(key, 6)

    def linear(kw, kb, fan_in, fan_out):
        bound = 1.0 / jnp.sqrt(fan_in)   # torch.nn.Linear default bound
        w = jax.random.uniform(kw, (fan_in, fan_out), jnp.float32, -bound, bound)
        b = jax.random.uniform(kb, (fan_out,), jnp.float32, -bound, bound)
        return w, b

    w1, b1 = linear(ks[0], ks[1], INPUT_SIZE, H1)
    w2, b2 = linear(ks[2], ks[3], H1, H2)
    w3, b3 = linear(ks[4], ks[5], H2, OUT)
    return w1, b1, w2, b2, w3, b3


def reference_forward(x, w1, b1, w2, b2, w3, b3):
    """Same math, mirroring the kernel's bf16 rounding points (f32 accumulate)."""
    bf, f32 = jnp.bfloat16, jnp.float32
    xb, w1b, w2b, w3b = x.astype(bf), w1.astype(bf), w2.astype(bf), w3.astype(bf)
    h1 = jnp.maximum(jnp.dot(xb, w1b, preferred_element_type=f32).astype(bf)
                     + b1.astype(bf), 0)
    h2 = jnp.maximum(jnp.dot(h1, w2b, preferred_element_type=f32).astype(bf)
                     + b2.astype(bf), 0)
    logits = jnp.dot(h2, w3b, preferred_element_type=f32) + b3.reshape(1, -1)
    return jax.nn.sigmoid(logits)


if __name__ == "__main__":
    key = jax.random.PRNGKey(0)
    k_x1, k_x2, k_p = jax.random.split(key, 3)
    params = init_params(k_p)
    prepped = prepare_params(*params)                 # one-time weight pad/cast

    fwd = jax.jit(discriminator_forward, static_argnames=("tb",))

    # Small batch: single grid step, whole padded batch resident in VMEM.
    batch = 8
    x = jax.random.normal(k_x1, (batch, INPUT_SIZE), dtype=jnp.float32)
    out = jax.block_until_ready(fwd(x, *prepped))
    ref = reference_forward(x, *params)
    assert out.shape == (batch, OUT)
    assert jnp.allclose(out, ref, atol=5e-3), "mismatch vs reference (batch=8)"

    # Ragged batch with a small tile to exercise the multi-step grid + padding path.
    batch2 = 300
    x2 = jax.random.normal(k_x2, (batch2, INPUT_SIZE), dtype=jnp.float32)
    out2 = jax.block_until_ready(fwd(x2, *prepped, tb=128))
    ref2 = reference_forward(x2, *params)
    assert out2.shape == (batch2, OUT)
    assert jnp.allclose(out2, ref2, atol=5e-3), "mismatch vs reference (batch=300)"

    print("KERNEL_OK")
</pallas_src>

<mosaic_0001>
module attributes {stable_mosaic.version = 11 : i64} {
  func.func @_disc_kernel(%arg0: i32, %arg1: memref<16x128xbf16, #tpu.memory_space<vmem>>, %arg2: memref<128x512xbf16, #tpu.memory_space<vmem>>, %arg3: memref<1x512xbf16, #tpu.memory_space<vmem>>, %arg4: memref<512x256xbf16, #tpu.memory_space<vmem>>, %arg5: memref<1x256xbf16, #tpu.memory_space<vmem>>, %arg6: memref<1x256xbf16, #tpu.memory_space<vmem>>, %arg7: memref<1x1xf32, #tpu.memory_space<vmem>>, %arg8: memref<1x16xf32, #tpu.memory_space<vmem>>) attributes {dimension_semantics = [#tpu.dimension_semantics<parallel>], iteration_bounds = array<i64: 1>, scalar_prefetch = 0 : i64, scratch_operands = 0 : i64, tpu.core_type = #tpu.core_type<tc>, window_params = [{transform_indices = @transform_0, window_bounds = array<i64: 16, 128>}, {pipeline_mode = #tpu.pipeline_mode<synchronous>, transform_indices = @transform_1, window_bounds = array<i64: 128, 512>}, {pipeline_mode = #tpu.pipeline_mode<synchronous>, transform_indices = @transform_2, window_bounds = array<i64: 1, 512>}, {pipeline_mode = #tpu.pipeline_mode<synchronous>, transform_indices = @transform_3, window_bounds = array<i64: 512, 256>}, {pipeline_mode = #tpu.pipeline_mode<synchronous>, transform_indices = @transform_4, window_bounds = array<i64: 1, 256>}, {pipeline_mode = #tpu.pipeline_mode<synchronous>, transform_indices = @transform_5, window_bounds = array<i64: 1, 256>}, {pipeline_mode = #tpu.pipeline_mode<synchronous>, transform_indices = @transform_6, window_bounds = array<i64: 1, 1>}, {transform_indices = @transform_7, window_bounds = array<i64: 1, 16>}]} {
    %c0 = arith.constant 0 : index
    %c0_0 = arith.constant 0 : index
    %0 = vector.load %arg1[%c0, %c0_0] : memref<16x128xbf16, #tpu.memory_space<vmem>>, vector<16x128xbf16>
    %c0_1 = arith.constant 0 : index
    %c0_2 = arith.constant 0 : index
    %1 = vector.load %arg2[%c0_1, %c0_2] : memref<128x512xbf16, #tpu.memory_space<vmem>>, vector<128x512xbf16>
    %cst = arith.constant dense<0.000000e+00> : vector<16x512xf32>
    %2 = tpu.matmul %0, %1, %cst {dimension_numbers = #tpu.dot_dimension_numbers<[1], [0], [0], [1], [0, 0, 1, 1], [], []>} : vector<16x128xbf16>, vector<128x512xbf16>, vector<16x512xf32> -> vector<16x512xf32>
    %3 = arith.truncf %2 : vector<16x512xf32> to vector<16x512xbf16>
    %c0_3 = arith.constant 0 : index
    %c0_4 = arith.constant 0 : index
    %4 = vector.load %arg3[%c0_3, %c0_4] : memref<1x512xbf16, #tpu.memory_space<vmem>>, vector<1x512xbf16>
    %5 = vector.broadcast %4 : vector<1x512xbf16> to vector<16x512xbf16>
    %6 = arith.addf %3, %5 : vector<16x512xbf16>
    %cst_5 = arith.constant 0.000000e+00 : bf16
    %7 = vector.broadcast %cst_5 : bf16 to vector<16x512xbf16>
    %8 = arith.maximumf %6, %7 : vector<16x512xbf16>
    %c0_6 = arith.constant 0 : index
    %c0_7 = arith.constant 0 : index
    %9 = vector.load %arg4[%c0_6, %c0_7] : memref<512x256xbf16, #tpu.memory_space<vmem>>, vector<512x256xbf16>
    %cst_8 = arith.constant dense<0.000000e+00> : vector<16x256xf32>
    %10 = tpu.matmul %8, %9, %cst_8 {dimension_numbers = #tpu.dot_dimension_numbers<[1], [0], [0], [1], [0, 0, 1, 1], [], []>} : vector<16x512xbf16>, vector<512x256xbf16>, vector<16x256xf32> -> vector<16x256xf32>
    %11 = arith.truncf %10 : vector<16x256xf32> to vector<16x256xbf16>
    %c0_9 = arith.constant 0 : index
    %c0_10 = arith.constant 0 : index
    %12 = vector.load %arg5[%c0_9, %c0_10] : memref<1x256xbf16, #tpu.memory_space<vmem>>, vector<1x256xbf16>
    %13 = vector.broadcast %12 : vector<1x256xbf16> to vector<16x256xbf16>
    %14 = arith.addf %11, %13 : vector<16x256xbf16>
    %cst_11 = arith.constant 0.000000e+00 : bf16
    %15 = vector.broadcast %cst_11 : bf16 to vector<16x256xbf16>
    %16 = arith.maximumf %14, %15 : vector<16x256xbf16>
    %c0_12 = arith.constant 0 : index
    %c0_13 = arith.constant 0 : index
    %17 = vector.load %arg6[%c0_12, %c0_13] : memref<1x256xbf16, #tpu.memory_space<vmem>>, vector<1x256xbf16>
    %cst_14 = arith.constant dense<0.000000e+00> : vector<1x16xf32>
    %18 = tpu.matmul %17, %16, %cst_14 {dimension_numbers = #tpu.dot_dimension_numbers<[1], [1], [0], [0], [0, 0, 1, 0], [], []>} : vector<1x256xbf16>, vector<16x256xbf16>, vector<1x16xf32> -> vector<1x16xf32>
    %c0_15 = arith.constant 0 : index
    %c0_16 = arith.constant 0 : index
    %19 = vector.load %arg7[%c0_15, %c0_16] : memref<1x1xf32, #tpu.memory_space<vmem>>, vector<1x1xf32>
    %20 = vector.broadcast %19 : vector<1x1xf32> to vector<1x16xf32>
    %21 = arith.addf %18, %20 : vector<1x16xf32>
    %cst_17 = arith.constant 0.000000e+00 : f32
    %22 = vector.broadcast %cst_17 : f32 to vector<1x16xf32>
    %23 = arith.subf %22, %21 : vector<1x16xf32>
    %24 = math.exp %23 : vector<1x16xf32>
    %cst_18 = arith.constant 1.000000e+00 : f32
    %25 = vector.broadcast %cst_18 : f32 to vector<1x16xf32>
    %26 = arith.addf %25, %24 : vector<1x16xf32>
    %27 = tpu.reciprocal %26 {approx = true} : vector<1x16xf32> -> vector<1x16xf32>
    %c0_19 = arith.constant 0 : index
    %c0_20 = arith.constant 0 : index
    %28 = vector.load %arg8[%c0_19, %c0_20] : memref<1x16xf32, #tpu.memory_space<vmem>>, vector<1x16xf32>
    tpu.vector_store %arg8[%c0_19, %c0_20], %27 {strides = array<i32>} : memref<1x16xf32, #tpu.memory_space<vmem>>, vector<1x16xf32>,
    return
  }
  func.func @transform_0(%arg0: i32) -> (i32, i32) {
    %c0_i32 = arith.constant 0 : i32
    %c0_i32_0 = arith.constant 0 : i32
    return %arg0, %c0_i32 : i32, i32
  }
  func.func @transform_1(%arg0: i32) -> (i32, i32) {
    %c0_i32 = arith.constant 0 : i32
    %c0_i32_0 = arith.constant 0 : i32
    %c0_i32_1 = arith.constant 0 : i32
    return %c0_i32, %c0_i32_0 : i32, i32
  }
  func.func @transform_2(%arg0: i32) -> (i32, i32) {
    %c0_i32 = arith.constant 0 : i32
    %c0_i32_0 = arith.constant 0 : i32
    %c0_i32_1 = arith.constant 0 : i32
    return %c0_i32, %c0_i32_0 : i32, i32
  }
  func.func @transform_3(%arg0: i32) -> (i32, i32) {
    %c0_i32 = arith.constant 0 : i32
    %c0_i32_0 = arith.constant 0 : i32
    %c0_i32_1 = arith.constant 0 : i32
    return %c0_i32, %c0_i32_0 : i32, i32
  }
  func.func @transform_4(%arg0: i32) -> (i32, i32) {
    %c0_i32 = arith.constant 0 : i32
    %c0_i32_0 = arith.constant 0 : i32
    %c0_i32_1 = arith.constant 0 : i32
    return %c0_i32, %c0_i32_0 : i32, i32
  }
  func.func @transform_5(%arg0: i32) -> (i32, i32) {
    %c0_i32 = arith.constant 0 : i32
    %c0_i32_0 = arith.constant 0 : i32
    %c0_i32_1 = arith.constant 0 : i32
    return %c0_i32, %c0_i32_0 : i32, i32
  }
  func.func @transform_6(%arg0: i32) -> (i32, i32) {
    %c0_i32 = arith.constant 0 : i32
    %c0_i32_0 = arith.constant 0 : i32
    %c0_i32_1 = arith.constant 0 : i32
    return %c0_i32, %c0_i32_0 : i32, i32
  }
  func.func @transform_7(%arg0: i32) -> (i32, i32) {
    %c0_i32 = arith.constant 0 : i32
    %c0_i32_0 = arith.constant 0 : i32
    return %c0_i32, %arg0 : i32, i32
  }
}

</mosaic_0001>

<bundles_post_ra>
// kernel: discriminator_forward.1
= control target key start
LH: loop header
LB: loop body
LE: loop exit
PB: predicated region body
PF: predicated region fallthrough
CT: control target
= control target key end

     0   :  { %s1438_s0 = inlined_call_operand.vmem [shape: bf16[16,128], index: 0, kind: input, shape index: {}]   ;;  %s1439_s1 = inlined_call_operand.hbm [shape: bf16[128,512], index: 1, kind: input, shape index: {}]   ;;  %s1440_s2 = inlined_call_operand.vmem [shape: bf16[1,512], index: 2, kind: input, shape index: {}]   ;;  %s1441_s3 = inlined_call_operand.hbm [shape: bf16[512,256], index: 3, kind: input, shape index: {}]   ;;  %s1442_s4 = inlined_call_operand.vmem [shape: bf16[1,256], index: 4, kind: input, shape index: {}]   ;;  %s1443_s5 = inlined_call_operand.vmem [shape: bf16[1,256], index: 5, kind: input, shape index: {}]   ;;  %s1444_s6 = inlined_call_operand.<no memory space> [shape: f32[1,1], index: 6, kind: input, shape index: {}]   ;;  %s1445_s7 = inlined_call_operand.vmem [shape: f32[1,16], index: 7, kind: output, shape index: {}]  }
   0x1   :  { %v12_v0 = vstv %s1444_s6 }
   0x2   :  { %13 = vst [vmem:[#allocation2] sm:$0x1] %v12_v0 }
   0x3   :  { %14 = vsyncpa [#allocation4], 0 }
   0x4   :  { %15 = vsyncpa [#allocation6], 0  ;;  %s1322_s26 = smov [#allocation3]   ;;  %s1274_s30 = scalar_lea.hbm %s1439_s1, 4096 }
   0x5   :  { %s23_s27 = sshll.u32 %s1322_s26, 4  ;;  %p1275_p0 = scmp.ne.s32.totalorder %s1439_s1, %s1274_s30  ;;  %s24_s27 = int_to_ptr.vmem [resolvable:$true] %s23_s27 }
   0x6   :  { %p1278_p1 = scmp.lt.u32.totalorder %s1274_s30, %s1439_s1 }
   0x8   :  { %p1280_p2 = pnand %p1278_p1, %p1275_p0 }
   0xa   :  { %1283 = shalt.err (!%p1280_p2)
}
   0xb   :  { %s1284_s6 = scalar_lea.vmem %s24_s27, 4096  ;;  %p1289_p4 = scmp.lt.s32.totalorder %s24_s27, %s24_s27 }
   0xc   :  { %p1285_p3 = scmp.ne.s32.totalorder %s24_s27, %s1284_s6  ;;  %p1290_p5 = scmp.lt.s32.totalorder %s1284_s6, %s1284_s6 }
   0xe   :  { %p1291_p6 = por %p1290_p5, %p1289_p4 }
  0x10   :  { %p1292_p7 = pnand %p1291_p6, %p1285_p3 }
  0x12   :  { %1295 = shalt.err (!%p1292_p7)
}
  0x13   :  { %s1323_s12 = smov 256   ;;  %s1324_s13 = smov 16  }
  0x14   :  { %29 = dma.hbm_to_vmem [thread:$0]  %s1439_s1, 4096, %s24_s27, [#allocation4], %s1323_s12, %s1323_s12, %s1324_s13  }
  0x15   :  { %s1325_s16 = smov [#allocation5]   ;;  %s1296_s20 = scalar_lea.hbm %s1441_s3, 8192 }
  0x16   :  { %s37_s17 = sshll.u32 %s1325_s16, 4  ;;  %p1297_p8 = scmp.ne.s32.totalorder %s1441_s3, %s1296_s20  ;;  %s38_s17 = int_to_ptr.vmem [resolvable:$true] %s37_s17 }
  0x17   :  { %p1300_p9 = scmp.lt.u32.totalorder %s1296_s20, %s1441_s3 }
  0x19   :  { %p1302_p10 = pnand %p1300_p9, %p1297_p8 }
  0x1b   :  { %1305 = shalt.err (!%p1302_p10)
}
  0x1c   :  { %s1306_s25 = scalar_lea.vmem %s38_s17, 8192  ;;  %p1311_p12 = scmp.lt.s32.totalorder %s38_s17, %s38_s17 }
  0x1d   :  { %p1307_p11 = scmp.ne.s32.totalorder %s38_s17, %s1306_s25  ;;  %p1312_p13 = scmp.lt.s32.totalorder %s1306_s25, %s1306_s25 }
  0x1f   :  { %p1313_p0 = por %p1312_p13, %p1311_p12 }
  0x21   :  { %p1314_p1 = pnand %p1313_p0, %p1307_p11 }
  0x23   :  { %1317 = shalt.err (!%p1314_p1)
}
  0x24   :  { %s1326_s1 = smov 128   ;;  %s1327_s26 = smov 8  }
  0x25   :  { %43 = dma.hbm_to_vmem [thread:$0]  %s1441_s3, 8192, %s38_s17, [#allocation6], %s1326_s1, %s1326_s1, %s1327_s26  }
  0x26   :  { %1318 = dma.done.wait [#allocation4], 4096  }
  0x27   :  { %1319 = vsyncadd [#allocation4], 4294963200 }
  0x28   :  { %1320 = dma.done.wait [#allocation6], 8192  }
  0x29   :  { %1321 = vsyncadd [#allocation6], 4294959104  ;;  %v1328_v1 = vmov 0   ;;  %v1125_v2 = vld [vmem:[#allocation3 + $0x4] ss:$16 sps:$4 sm:$0xff]   ;;  %vm1004_vm0 = vcmask 122880  }
  0x2a   :  { %289 = vmatprep.mubr.bf16.mxu0 %v1328_v1  ;;  %332 = vmatprep.mubr.bf16.mxu1 %v1328_v1  ;;  %v1127_v3 = vld [vmem:[#allocation3 + $0xc] ss:$16 sps:$4 sm:$0xff]   ;;  %v1129_v4 = vld [vmem:[#allocation3] ss:$16 sps:$4 sm:$0xff]   ;;  %v1130_v5 = vld [vmem:[#allocation3 + $0x8] ss:$16 sps:$4 sm:$0xff]  }
  0x2b   :  { %1124 = vset.pattern.permute.xlu0 %v1328_v1  ;;  %257 = vmatprep.subr.bf16.mxu0 %v1125_v2  ;;  %v1131_v6 = vld [vmem:[#allocation3 + $0x24] ss:$16 sps:$4 sm:$0xff]   ;;  %v1133_v7 = vld [vmem:[#allocation3 + $0x2c] ss:$16 sps:$4 sm:$0xff]   ;;  %v1135_v8 = vld [vmem:[#allocation3 + $0x20] ss:$16 sps:$4 sm:$0xff]  }
  0x2c   :  { %300 = vmatprep.subr.bf16.mxu1 %v1127_v3  ;;  %258 = vmatpush1.bf16.msra.mxu0 %v1129_v4  ;;  %v1136_v9 = vld [vmem:[#allocation3 + $0x28] ss:$16 sps:$4 sm:$0xff]   ;;  %v1137_v10 = vld [vmem:[#allocation3 + $0x44] ss:$16 sps:$4 sm:$0xff]   ;;  %v1139_v11 = vld [vmem:[#allocation3 + $0x4c] ss:$16 sps:$4 sm:$0xff]  }
  0x2d   :  { %301 = vmatpush1.bf16.msra.mxu1 %v1130_v5  ;;  %259 = vmatprep.subr.bf16.mxu0 %v1131_v6  ;;  %v1141_v12 = vld [vmem:[#allocation3 + $0x40] ss:$16 sps:$4 sm:$0xff]   ;;  %v1142_v13 = vld [vmem:[#allocation3 + $0x48] ss:$16 sps:$4 sm:$0xff]   ;;  %v1143_v14 = vld [vmem:[#allocation3 + $0x64] ss:$16 sps:$4 sm:$0xff]  }
  0x2e   :  { %302 = vmatprep.subr.bf16.mxu1 %v1133_v7  ;;  %v1145_v15 = vld [vmem:[#allocation3 + $0x6c] ss:$16 sps:$4 sm:$0xff]   ;;  %v1147_v16 = vld [vmem:[#allocation3 + $0x60] ss:$16 sps:$4 sm:$0xff]   ;;  %v1148_v17 = vld [vmem:[#allocation3 + $0x68] ss:$16 sps:$4 sm:$0xff]  }
  0x2f   :  { %v1149_v18 = vld [vmem:[#allocation3 + $0x84] ss:$16 sps:$4 sm:$0xff]   ;;  %v1151_v19 = vld [vmem:[#allocation3 + $0x8c] ss:$16 sps:$4 sm:$0xff]   ;;  %v1153_v20 = vld [vmem:[#allocation3 + $0x80] ss:$16 sps:$4 sm:$0xff]  }
  0x30   :  { %260 = vmatpush1.bf16.msra.mxu0 %v1135_v8  ;;  %v1154_v21 = vld [vmem:[#allocation3 + $0x88] ss:$16 sps:$4 sm:$0xff]   ;;  %v1155_v22 = vld [vmem:[#allocation3 + $0xa4] ss:$16 sps:$4 sm:$0xff]   ;;  %v1157_v23 = vld [vmem:[#allocation3 + $0xac] ss:$16 sps:$4 sm:$0xff]  }
  0x31   :  { %303 = vmatpush1.bf16.msra.mxu1 %v1136_v9  ;;  %261 = vmatprep.subr.bf16.mxu0 %v1137_v10  ;;  %v1159_v24 = vld [vmem:[#allocation3 + $0xa0] ss:$16 sps:$4 sm:$0xff]   ;;  %v1160_v25 = vld [vmem:[#allocation3 + $0xa8] ss:$16 sps:$4 sm:$0xff]   ;;  %v1161_v26 = vld [vmem:[#allocation3 + $0xc4] ss:$16 sps:$4 sm:$0xff]  }
  0x32   :  { %304 = vmatprep.subr.bf16.mxu1 %v1139_v11  ;;  %v1163_v27 = vld [vmem:[#allocation3 + $0xcc] ss:$16 sps:$4 sm:$0xff]   ;;  %v1165_v28 = vld [vmem:[#allocation3 + $0xc0] ss:$16 sps:$4 sm:$0xff]   ;;  %v1166_v29 = vld [vmem:[#allocation3 + $0xc8] ss:$16 sps:$4 sm:$0xff]  }
  0x33   :  { %v1167_v30 = vld [vmem:[#allocation3 + $0xe4] ss:$16 sps:$4 sm:$0xff]   ;;  %v1169_v31 = vld [vmem:[#allocation3 + $0xec] ss:$16 sps:$4 sm:$0xff]   ;;  %v1171_v32 = vld [vmem:[#allocation3 + $0xe0] ss:$16 sps:$4 sm:$0xff]  }
  0x34   :  { %262 = vmatpush1.bf16.msra.mxu0 %v1141_v12  ;;  %v1172_v33 = vld [vmem:[#allocation3 + $0xe8] ss:$16 sps:$4 sm:$0xff]   ;;  %v1176_v34 = vld [vmem:[#allocation5 + $0x4] ss:$8 sps:$4 sm:$0xff]   ;;  %v1182_v39 = vld [vmem:[#allocation5 + $0x14] ss:$8 sps:$4 sm:$0xff]  }
  0x35   :  { %305 = vmatpush1.bf16.msra.mxu1 %v1142_v13  ;;  %263 = vmatprep.subr.bf16.mxu0 %v1143_v14  ;;  %v1179_v35 = vld [vmem:[#allocation5 + $0x104] ss:$8 sps:$4 sm:$0xff]   ;;  %v1174_v37 = vld [vmem:[#allocation5] ss:$8 sps:$4 sm:$0xff]   ;;  %v1185_v40 = vld [vmem:[#allocation5 + $0x114] ss:$8 sps:$4 sm:$0xff]  }
  0x36   :  { %306 = vmatprep.subr.bf16.mxu1 %v1145_v15  ;;  %v1173_v36 = vld [vmem:[%s1438_s0] sm:$0xff]   ;;  %v1180_v41 = vld [vmem:[#allocation5 + $0x10] ss:$8 sps:$4 sm:$0xff]  }
  0x37   :  { %v1177_v38 = vld [vmem:[#allocation5 + $0x100] ss:$8 sps:$4 sm:$0xff]   ;;  %v1183_v42 = vld [vmem:[#allocation5 + $0x110] ss:$8 sps:$4 sm:$0xff]   ;;  %v1188_v43 = vld [vmem:[#allocation5 + $0x24] ss:$8 sps:$4 sm:$0xff]  }
  0x38   :  { %264 = vmatpush1.bf16.msra.mxu0 %v1147_v16  ;;  %v1191_v44 = vld [vmem:[#allocation5 + $0x124] ss:$8 sps:$4 sm:$0xff]   ;;  %v1186_v45 = vld [vmem:[#allocation5 + $0x20] ss:$8 sps:$4 sm:$0xff]   ;;  %v1194_v47 = vld [vmem:[#allocation5 + $0x34] ss:$8 sps:$4 sm:$0xff]  }
  0x39   :  { %307 = vmatpush1.bf16.msra.mxu1 %v1148_v17  ;;  %265 = vmatprep.subr.bf16.mxu0 %v1149_v18  ;;  %v1189_v46 = vld [vmem:[#allocation5 + $0x120] ss:$8 sps:$4 sm:$0xff]   ;;  %v1197_v48 = vld [vmem:[#allocation5 + $0x134] ss:$8 sps:$4 sm:$0xff]   ;;  %v1192_v49 = vld [vmem:[#allocation5 + $0x30] ss:$8 sps:$4 sm:$0xff]  }
  0x3a   :  { %308 = vmatprep.subr.bf16.mxu1 %v1151_v19  ;;  %v1195_v50 = vld [vmem:[#allocation5 + $0x130] ss:$8 sps:$4 sm:$0xff]   ;;  %v1200_v51 = vld [vmem:[#allocation5 + $0x44] ss:$8 sps:$4 sm:$0xff]   ;;  %v1198_v53 = vld [vmem:[#allocation5 + $0x40] ss:$8 sps:$4 sm:$0xff]  }
  0x3b   :  { %v1203_v52 = vld [vmem:[#allocation5 + $0x144] ss:$8 sps:$4 sm:$0xff]   ;;  %v1201_v54 = vld [vmem:[#allocation5 + $0x140] ss:$8 sps:$4 sm:$0xff]   ;;  %v1206_v55 = vld [vmem:[#allocation5 + $0x54] ss:$8 sps:$4 sm:$0xff]  }
  0x3c   :  { %266 = vmatpush1.bf16.msra.mxu0 %v1153_v20  ;;  %v1209_v56 = vld [vmem:[#allocation5 + $0x154] ss:$8 sps:$4 sm:$0xff]   ;;  %v1204_v57 = vld [vmem:[#allocation5 + $0x50] ss:$8 sps:$4 sm:$0xff]   ;;  %v1212_v59 = vld [vmem:[#allocation5 + $0x64] ss:$8 sps:$4 sm:$0xff]  }
  0x3d   :  { %309 = vmatpush1.bf16.msra.mxu1 %v1154_v21  ;;  %267 = vmatprep.subr.bf16.mxu0 %v1155_v22  ;;  %v1207_v58 = vld [vmem:[#allocation5 + $0x150] ss:$8 sps:$4 sm:$0xff]   ;;  %v1215_v60 = vld [vmem:[#allocation5 + $0x164] ss:$8 sps:$4 sm:$0xff]   ;;  %v1210_v61 = vld [vmem:[#allocation5 + $0x60] ss:$8 sps:$4 sm:$0xff]  }
  0x3e   :  { %310 = vmatprep.subr.bf16.mxu1 %v1157_v23  ;;  %v1213_v62 = vld [vmem:[#allocation5 + $0x160] ss:$8 sps:$4 sm:$0xff]   ;;  %v1218_v63 = vld [vmem:[#allocation5 + $0x74] ss:$8 sps:$4 sm:$0xff]   ;;  %v1216_v2 = vld [vmem:[#allocation5 + $0x70] ss:$8 sps:$4 sm:$0xff]  }
  0x3f   :  { %v1221_v0 = vld [vmem:[#allocation5 + $0x174] ss:$8 sps:$4 sm:$0xff]   ;;  %v1219_v3 = vld [vmem:[#allocation5 + $0x170] ss:$8 sps:$4 sm:$0xff]   ;;  %v1224_v4 = vld [vmem:[#allocation5 + $0x84] ss:$8 sps:$4 sm:$0xff]  }
  0x40   :  { %268 = vmatpush1.bf16.msra.mxu0 %v1159_v24  ;;  %v1227_v5 = vld [vmem:[#allocation5 + $0x184] ss:$8 sps:$4 sm:$0xff]   ;;  %v1222_v6 = vld [vmem:[#allocation5 + $0x80] ss:$8 sps:$4 sm:$0xff]   ;;  %v1230_v8 = vld [vmem:[#allocation5 + $0x94] ss:$8 sps:$4 sm:$0xff]  }
  0x41   :  { %311 = vmatpush1.bf16.msra.mxu1 %v1160_v25  ;;  %269 = vmatprep.subr.bf16.mxu0 %v1161_v26  ;;  %v1225_v7 = vld [vmem:[#allocation5 + $0x180] ss:$8 sps:$4 sm:$0xff]   ;;  %v1233_v9 = vld [vmem:[#allocation5 + $0x194] ss:$8 sps:$4 sm:$0xff]   ;;  %v1228_v10 = vld [vmem:[#allocation5 + $0x90] ss:$8 sps:$4 sm:$0xff]  }
  0x42   :  { %312 = vmatprep.subr.bf16.mxu1 %v1163_v27  ;;  %v1231_v11 = vld [vmem:[#allocation5 + $0x190] ss:$8 sps:$4 sm:$0xff]   ;;  %v1236_v12 = vld [vmem:[#allocation5 + $0xa4] ss:$8 sps:$4 sm:$0xff]   ;;  %v1234_v14 = vld [vmem:[#allocation5 + $0xa0] ss:$8 sps:$4 sm:$0xff]  }
  0x43   :  { %v1239_v13 = vld [vmem:[#allocation5 + $0x1a4] ss:$8 sps:$4 sm:$0xff]   ;;  %v1237_v15 = vld [vmem:[#allocation5 + $0x1a0] ss:$8 sps:$4 sm:$0xff]   ;;  %v1242_v16 = vld [vmem:[#allocation5 + $0xb4] ss:$8 sps:$4 sm:$0xff]  }
  0x44   :  { %270 = vmatpush1.bf16.msra.mxu0 %v1165_v28  ;;  %v1245_v17 = vld [vmem:[#allocation5 + $0x1b4] ss:$8 sps:$4 sm:$0xff]   ;;  %v1240_v18 = vld [vmem:[#allocation5 + $0xb0] ss:$8 sps:$4 sm:$0xff]   ;;  %v1248_v20 = vld [vmem:[#allocation5 + $0xc4] ss:$8 sps:$4 sm:$0xff]  }
  0x45   :  { %313 = vmatpush1.bf16.msra.mxu1 %v1166_v29  ;;  %271 = vmatprep.subr.bf16.mxu0 %v1167_v30  ;;  %v1243_v19 = vld [vmem:[#allocation5 + $0x1b0] ss:$8 sps:$4 sm:$0xff]   ;;  %v1251_v21 = vld [vmem:[#allocation5 + $0x1c4] ss:$8 sps:$4 sm:$0xff]   ;;  %v1246_v22 = vld [vmem:[#allocation5 + $0xc0] ss:$8 sps:$4 sm:$0xff]  }
  0x46   :  { %314 = vmatprep.subr.bf16.mxu1 %v1169_v31  ;;  %v1249_v23 = vld [vmem:[#allocation5 + $0x1c0] ss:$8 sps:$4 sm:$0xff]   ;;  %v1254_v24 = vld [vmem:[#allocation5 + $0xd4] ss:$8 sps:$4 sm:$0xff]   ;;  %v1252_v26 = vld [vmem:[#allocation5 + $0xd0] ss:$8 sps:$4 sm:$0xff]  }
  0x47   :  { %v1257_v25 = vld [vmem:[#allocation5 + $0x1d4] ss:$8 sps:$4 sm:$0xff]   ;;  %v1255_v27 = vld [vmem:[#allocation5 + $0x1d0] ss:$8 sps:$4 sm:$0xff]   ;;  %v1260_v28 = vld [vmem:[#allocation5 + $0xe4] ss:$8 sps:$4 sm:$0xff]  }
  0x48   :  { %272 = vmatpush1.bf16.msra.mxu0 %v1171_v32  ;;  %v1263_v29 = vld [vmem:[#allocation5 + $0x1e4] ss:$8 sps:$4 sm:$0xff]   ;;  %v1258_v30 = vld [vmem:[#allocation5 + $0xe0] ss:$8 sps:$4 sm:$0xff]   ;;  %v1266_v32 = vld [vmem:[#allocation5 + $0xf4] ss:$8 sps:$4 sm:$0xff]  }
  0x49   :  { %315 = vmatpush1.bf16.msra.mxu1 %v1172_v33  ;;  %836 = vmatprep.subr.bf16.mxu0 %v1179_v35  ;;  %v1261_v31 = vld [vmem:[#allocation5 + $0x1e0] ss:$8 sps:$4 sm:$0xff]   ;;  %v1269_v33 = vld [vmem:[#allocation5 + $0x1f4] ss:$8 sps:$4 sm:$0xff]   ;;  %v1267_v35 = vld [vmem:[#allocation5 + $0x1f0] ss:$8 sps:$4 sm:$0xff]  }
  0x4a   :  { %793 = vmatprep.subr.bf16.mxu1 %v1176_v34  ;;  %v1264_v34 = vld [vmem:[#allocation5 + $0xf0] ss:$8 sps:$4 sm:$0xff]  }
  0x4b   :  { %290 = vmatmul.mubr.bf16.vlgmr.msra.gmra.mrb[0].mxu0 %v1173_v36 }
  0x4c   :  { %333 = vmatmul.mubr.bf16.vlgmr.msra.gmra.mrb[0].mxu1 %v1173_v36  ;;  %837 = vmatpush1.bf16.msra.mxu0 %v1177_v38  ;;  %v1329_v36 = vmov 1966171168   ;;  %v360_v38 = vlaneseq }
  0x4d   :  { %794 = vmatpush1.bf16.msra.mxu1 %v1174_v37  ;;  %838 = vmatprep.subr.bf16.mxu0 %v1185_v40  ;;  %v358_v37 = vunpack.c.l.s4 %v1329_v36 }
  0x4e   :  { %795 = vmatprep.subr.bf16.mxu1 %v1182_v39  ;;  %v361_v40 = vshrl.u32 %v360_v38, 7 }
  0x4f   :  { %v359_v39 = vunpack.c.0.s8 %v358_v37 }
  0x50   :  { %839 = vmatpush1.bf16.msra.mxu0 %v1183_v42 }
  0x51   :  { %796 = vmatpush1.bf16.msra.mxu1 %v1180_v41  ;;  %840 = vmatprep.subr.bf16.mxu0 %v1191_v44  ;;  %v1045_v41 = vld.sshfl [vmem:[%s1440_s2] sm:$0x33 pattern:$0x75316420]  ;;  %v1406_v42 = vsub.s32 %v359_v39, %v361_v40 }
  0x52   :  { %797 = vmatprep.subr.bf16.mxu1 %v1188_v43  ;;  %v356_v43 = vcombine.high %v1045_v41, %v1045_v41 }
  0x53   :  { %v363_v44 = vrot.slane %v1045_v41, %v1406_v42 }
  0x54   :  { %841 = vmatpush1.bf16.msra.mxu0 %v1189_v46 }
  0x55   :  { %798 = vmatpush1.bf16.msra.mxu1 %v1186_v45  ;;  %842 = vmatprep.subr.bf16.mxu0 %v1197_v48  ;;  %v370_v45 = vrot.slane %v356_v43, %v1406_v42  ;;  %v371_v46 = vcombine.high %v363_v44, %v363_v44  ;;  %v374_v48 = vpack.i.b16 %v363_v44, %v363_v44 }
  0x56   :  { %799 = vmatprep.subr.bf16.mxu1 %v1194_v47 }
  0x57   :  { %v372_v47 = vcombine.high %v370_v45, %v370_v45 }
  0x58   :  { %843 = vmatpush1.bf16.msra.mxu0 %v1195_v50  ;;  %v388_v50 = vpack.i.b16 %v371_v46, %v371_v46 }
  0x59   :  { %800 = vmatpush1.bf16.msra.mxu1 %v1192_v49  ;;  %844 = vmatprep.subr.bf16.mxu0 %v1203_v52  ;;  %v1410_v49 = vsub.s32 0, %v361_v40  ;;  %v395_v52 = vpack.i.b16 %v372_v47, %v372_v47 }
  0x5a   :  { %801 = vmatprep.subr.bf16.mxu1 %v1200_v51  ;;  %v381_v51 = vpack.i.b16 %v370_v45, %v370_v45 }
  0x5c   :  { %845 = vmatpush1.bf16.msra.mxu0 %v1201_v54 }
  0x5d   :  { %802 = vmatpush1.bf16.msra.mxu1 %v1198_v53  ;;  %846 = vmatprep.subr.bf16.mxu0 %v1209_v56 }
  0x5e   :  { %803 = vmatprep.subr.bf16.mxu1 %v1206_v55 }
  0x60   :  { %847 = vmatpush1.bf16.msra.mxu0 %v1207_v58  ;;  %v393_v58 = vrot.slane %v388_v50, %v1410_v49 }
  0x61   :  { %804 = vmatpush1.bf16.msra.mxu1 %v1204_v57  ;;  %848 = vmatprep.subr.bf16.mxu0 %v1215_v60  ;;  %v379_v57 = vrot.slane %v374_v48, %v1410_v49 }
  0x62   :  { %805 = vmatprep.subr.bf16.mxu1 %v1212_v59 }
  0x64   :  { %849 = vmatpush1.bf16.msra.mxu0 %v1213_v62  ;;  %v400_v62 = vrot.slane %v395_v52, %v1410_v49 }
  0x65   :  { %806 = vmatpush1.bf16.msra.mxu1 %v1210_v61  ;;  %850 = vmatprep.subr.bf16.mxu0 %v1221_v0  ;;  %v386_v61 = vrot.slane %v381_v51, %v1410_v49 }
  0x66   :  { %807 = vmatprep.subr.bf16.mxu1 %v1218_v63 }
  0x68   :  { %851 = vmatpush1.bf16.msra.mxu0 %v1219_v3 }
  0x69   :  { %808 = vmatpush1.bf16.msra.mxu1 %v1216_v2  ;;  %852 = vmatprep.subr.bf16.mxu0 %v1227_v5 }
  0x6a   :  { %809 = vmatprep.subr.bf16.mxu1 %v1224_v4 }
  0x6c   :  { %853 = vmatpush1.bf16.msra.mxu0 %v1225_v7 }
  0x6d   :  { %810 = vmatpush1.bf16.msra.mxu1 %v1222_v6  ;;  %854 = vmatprep.subr.bf16.mxu0 %v1233_v9 }
  0x6e   :  { %811 = vmatprep.subr.bf16.mxu1 %v1230_v8 }
  0x70   :  { %855 = vmatpush1.bf16.msra.mxu0 %v1231_v11 }
  0x71   :  { %812 = vmatpush1.bf16.msra.mxu1 %v1228_v10  ;;  %856 = vmatprep.subr.bf16.mxu0 %v1239_v13 }
  0x72   :  { %813 = vmatprep.subr.bf16.mxu1 %v1236_v12 }
  0x74   :  { %857 = vmatpush1.bf16.msra.mxu0 %v1237_v15 }
  0x75   :  { %814 = vmatpush1.bf16.msra.mxu1 %v1234_v14  ;;  %858 = vmatprep.subr.bf16.mxu0 %v1245_v17  ;;  %v1111_v14 = vld.sshfl [vmem:[%s1443_s5] sm:$0x11 pattern:$0x75316420] }
  0x76   :  { %815 = vmatprep.subr.bf16.mxu1 %v1242_v16  ;;  %v942_v15 = vcombine.high %v1111_v14, %v1111_v14  ;;  %v924_v17 = vld [vmem:[#allocation2] sm:$0x1]  ;;  %v949_v45 = vrot.slane %v1111_v14, %v1406_v42 }
  0x77   :  { %927 = vperm.xlu0 %1124, %v924_v17  }
  0x78   :  { %859 = vmatpush1.bf16.msra.mxu0 %v1243_v19  ;;  %v956_v16 = vrot.slane %v942_v15, %v1406_v42 }
  0x79   :  { %816 = vmatpush1.bf16.msra.mxu1 %v1240_v18  ;;  %860 = vmatprep.subr.bf16.mxu0 %v1251_v21  ;;  %v1110_v18 = vld.sshfl [vmem:[%s1442_s4] sm:$0x11 pattern:$0x75316420] }
  0x7a   :  { %817 = vmatprep.subr.bf16.mxu1 %v1248_v20  ;;  %v890_v19 = vcombine.high %v1110_v18, %v1110_v18  ;;  %v897_v20 = vrot.slane %v1110_v18, %v1406_v42 }
  0x7c   :  { %861 = vmatpush1.bf16.msra.mxu0 %v1249_v23  ;;  %v904_v21 = vrot.slane %v890_v19, %v1406_v42 }
  0x7d   :  { %818 = vmatpush1.bf16.msra.mxu1 %v1246_v22  ;;  %862 = vmatprep.subr.bf16.mxu0 %v1257_v25  ;;  %v906_v22 = vpack.i.b16 %v897_v20, %v897_v20 }
  0x7e   :  { %819 = vmatprep.subr.bf16.mxu1 %v1254_v24  ;;  %v913_v25 = vpack.i.b16 %v904_v21, %v904_v21 }
  0x80   :  { %863 = vmatpush1.bf16.msra.mxu0 %v1255_v27  ;;  %v918_v37 = vrot.slane %v913_v25, %v1410_v49 }
  0x81   :  { %820 = vmatpush1.bf16.msra.mxu1 %v1252_v26  ;;  %864 = vmatprep.subr.bf16.mxu0 %v1263_v29 }
  0x82   :  { %821 = vmatprep.subr.bf16.mxu1 %v1260_v28 }
  0x84   :  { %865 = vmatpush1.bf16.msra.mxu0 %v1261_v31 }
  0x85   :  { %822 = vmatpush1.bf16.msra.mxu1 %v1258_v30  ;;  %866 = vmatprep.subr.bf16.mxu0 %v1269_v33  ;;  %v911_v33 = vrot.slane %v906_v22, %v1410_v49 }
  0x86   :  { %823 = vmatprep.subr.bf16.mxu1 %v1266_v32 }
  0x88   :  { %867 = vmatpush1.bf16.msra.mxu0 %v1267_v35 }
  0x89   :  { %824 = vmatpush1.bf16.msra.mxu1 %v1264_v34 }
  0xf6   :  { %v928_v46 = vpop.permute.xlu0 %927 }
  0xf7   :  { %v933_v47 = vrot.slane %v928_v46, %v1410_v49 }
 0x11e   :  { %v291_v53 = vpop.f32.mrb[0].mxu0 }
 0x11f   :  { %v334_v54 = vpop.f32.mrb[0].mxu1  ;;  %v293_v55 = vpop.f32.mrb[1].mxu0 }
 0x120   :  { %v336_v56 = vpop.f32.mrb[1].mxu1  ;;  %v295_v59 = vpop.f32.mrb[2].mxu0 }
 0x121   :  { %v338_v60 = vpop.f32.mrb[2].mxu1  ;;  %v343_v63 = vpack.c.bf16 %v295_v59, %v291_v53  ;;  %v297_v2 = vpop.f32.mrb[3].mxu0 }
 0x122   :  { %v345_v0 = vpack.c.bf16 %v338_v60, %v334_v54  ;;  %v340_v3 = vpop.f32.mrb[3].mxu1  ;;  %v344_v4 = vpack.c.bf16 %v297_v2, %v293_v55 }
 0x123   :  { %v346_v5 = vpack.c.bf16 %v340_v3, %v336_v56  ;;  %v401_v6 = vadd.bf16 %v379_v57, %v343_v63 }
 0x124   :  { %v403_v7 = vadd.bf16 %v393_v58, %v345_v0  ;;  %v402_v8 = vadd.bf16 %v386_v61, %v344_v4 }
 0x125   :  { %v404_v9 = vadd.bf16 %v400_v62, %v346_v5  ;;  %v405_v12 = vmax.bf16 %v1328_v1, %v401_v6 }
 0x126   :  { %v406_v10 = vmax.bf16 %v1328_v1, %v402_v8  ;;  %v407_v13 = vmax.bf16 %v1328_v1, %v403_v7 }
 0x127   :  { %v408_v11 = vmax.bf16 %v1328_v1, %v404_v9 }
 0x128   :  { %825 = vmatprep.mubr.bf16.mxu1 %v406_v10 }
 0x129   :  { %868 = vmatprep.mubr.bf16.mxu0 %v408_v11  ;;  %826 = vmatmul.mubr.bf16.vlgmr.msra.gmra.mrb[4].mxu1 %v405_v12 }
 0x12a   :  { %869 = vmatmul.mubr.bf16.vlgmr.msra.gmra.mrb[4].mxu0 %v407_v13  ;;  %991 = vmatprep.mubr.bf16.mxu1 %v956_v16 }
 0x1fc   :  { %v827_v23 = vpop.f32.mrb[4].mxu1 }
 0x1fd   :  { %v870_v24 = vpop.f32.mrb[4].mxu0  ;;  %v829_v27 = vpop.f32.mrb[5].mxu1 }
 0x1fe   :  { %v871_v26 = vadd.f32 %v870_v24, %v827_v23  ;;  %v872_v28 = vpop.f32.mrb[5].mxu0  ;;  %v831_v30 = vpop.f32.mrb[6].mxu1 }
 0x1ff   :  { %v873_v29 = vadd.f32 %v872_v28, %v829_v27  ;;  %v874_v31 = vpop.f32.mrb[6].mxu0  ;;  %v833_v34 = vpop.f32.mrb[7].mxu1 }
 0x200   :  { %v875_v32 = vadd.f32 %v874_v31, %v831_v30  ;;  %v876_v35 = vpop.f32.mrb[7].mxu0 }
 0x201   :  { %v877_v36 = vadd.f32 %v876_v35, %v833_v34 }
 0x202   :  { %v879_v38 = vpack.c.bf16 %v875_v32, %v871_v26 }
 0x203   :  { %v880_v39 = vpack.c.bf16 %v877_v36, %v873_v29 }
 0x204   :  { %v919_v40 = vadd.bf16 %v911_v33, %v879_v38 }
 0x205   :  { %v920_v41 = vadd.bf16 %v918_v37, %v880_v39 }
 0x206   :  { %v921_v44 = vmax.bf16 %v1328_v1, %v919_v40 }
 0x207   :  { %v922_v43 = vmax.bf16 %v1328_v1, %v920_v41 }
 0x209   :  { %959 = vmatprep.subr.bf16.mxu1 %v922_v43 }
 0x20a   :  { %960 = vmatpush1.bf16.xpose.msra.mxu1 %v921_v44 }
 0x211   :  { %992 = vmatmul.mubr.bf16.vlgmr.msra.gmra.mrb[8].mxu1 %v949_v45 }
 0x2e4   :  { %v993_v48 = vpop.f32.mrb[8].mxu1 }
 0x2e5   :  { %v994_v50 = vadd.f32 %v993_v48, %v933_v47  ;;  %v995_v51 = vpop.f32.mrb[9].mxu1 }
 0x2e6   :  { %v996_v52 = vpop.f32.mrb[10].mxu1 }
 0x2e7   :  { %v999_v53 = vsub.f32 0.0, %v994_v50  ;;  %v997_v54 = vpop.f32.mrb[11].mxu1 }
 0x2e9   :  { %v1000_v55 = vmul.f32 1.442695, %v999_v53 }
 0x2eb   :  { %1270 = vpow2.f32 %v1000_v55 }
 0x2f5   :  { %v1271_v56 = vpop.eup %1270 }
 0x2f6   :  { %v1002_v57 = vadd.f32 1.0, %v1271_v56 }
 0x2f8   :  { %1272 = vrcp.f32 %v1002_v57 }
 0x302   :  { %v1273_v1 = vpop.eup %1272 }
 0x303   :  { %1005 = vst.msk [vmem:[%s1445_s7] sm:$0x1] %vm1004_vm0, %v1273_v1 }
 0x304   :  { %1010 = vsyncpa [#allocation4], 1 }
 0x305   :  { %1011 = vsyncpa [#allocation6], 1 }

</bundles_post_ra>
